<compile_context>
chip_gen: v5e
topology: v5e:2x2
jax: 0.10.0
libtpu: 0.0.40
codegen_flags: <defaults>
</compile_context>

<pallas_src>
import functools

import jax
import jax.numpy as jnp
from jax import lax
from jax.experimental import pallas as pl
from jax.experimental.pallas import tpu as pltpu

LANE = 128
MAX_BLOCK_ROWS = 2048        # 2048*128*4B = 1 MiB per tile per input
CONFIDENCE_MARGIN = 6.0


def _contrastive_loss_kernel(stats_ref, yt_ref, yp_ref, o0_ref, o1_ref, o2_ref,
                             acc_ref, *, n_valid, block_rows, need_mask):
    # stats_ref : SMEM f32[2] = [ref_mean, 1/ref_std]
    # yt_ref/yp_ref : VMEM (block_rows, 128) tiles
    # o0/o1/o2  : SMEM f32[1,1] outputs (written on the last grid step)
    # acc_ref   : VMEM f32[3,8,128] resident per-lane partial-sum accumulator
    i = pl.program_id(0)
    ref_mean = stats_ref[0]
    inv_std = stats_ref[1]

    @pl.when(i == 0)
    def _():
        acc_ref[...] = jnp.zeros_like(acc_ref)

    yt = yt_ref[...].astype(jnp.float32)
    yp = yp_ref[...].astype(jnp.float32)

    if need_mask:
        # Element-level validity mask: covers both the lane-tail zero padding
        # and the (unspecified) rows of a partial last block.
        base = i * (block_rows * LANE)
        row_ids = lax.broadcasted_iota(jnp.int32, (block_rows, LANE), 0)
        lane_ids = lax.broadcasted_iota(jnp.int32, (block_rows, LANE), 1)
        valid = (base + row_ids * LANE + lane_ids) < n_valid
        yt = jnp.where(valid, yt, 0.0)        # kills y*inlier and y*outlier
        yp = jnp.where(valid, yp, ref_mean)   # -> dev = 0 -> inlier = 0

    dev = (yp - ref_mean) * inv_std
    inlier = jnp.abs(dev)
    outlier = jnp.maximum(CONFIDENCE_MARGIN - dev, 0.0)
    b = yt * inlier          # y * inlier
    c = yt * outlier         # y * outlier

    def fold(x):             # (block_rows, 128) -> (8, 128): pure vreg adds
        return jnp.sum(x.reshape(block_rows // 8, 8, LANE), axis=0)

    acc_ref[0] += fold(inlier)
    acc_ref[1] += fold(b)
    acc_ref[2] += fold(c)

    @pl.when(i == pl.num_programs(0) - 1)
    def _():
        s_in = jnp.sum(acc_ref[0])
        s_b = jnp.sum(acc_ref[1])
        s_c = jnp.sum(acc_ref[2])
        t1 = s_in - s_b                    # sum((1-y) * inlier)
        o0_ref[0, 0] = t1 + s_c            # sum((1-y)*inlier + y*outlier)
        o1_ref[0, 0] = t1
        o2_ref[0, 0] = s_b                 # sum(y * inlier)


def _prep(x):
    x = jnp.ravel(x)
    if x.dtype not in (jnp.dtype(jnp.float32), jnp.dtype(jnp.bfloat16)):
        x = x.astype(jnp.float32)
    return x


def contrastive_loss(y_true, y_pred, ref, *, max_block_rows=MAX_BLOCK_ROWS):
    """Returns (total_loss_mean, inlier_mean, true_weighted_inlier_mean)."""
    yt = _prep(y_true)
    yp = _prep(y_pred)
    n = yt.shape[0]

    ref = ref.astype(jnp.float32)
    ref_mean = jnp.mean(ref)
    inv_std = 1.0 / jnp.std(ref, ddof=1)   # torch.std default: unbiased (ddof=1)
    stats = jnp.stack([ref_mean, inv_std]).astype(jnp.float32)

    # Pad only to a multiple of the 128-lane width (<=127 elems); skipped when
    # already aligned. Pad values are irrelevant: they are masked in-kernel.
    rows = -(-n // LANE)
    padded = rows * LANE
    if padded != n:
        yt = jnp.concatenate([yt, jnp.zeros((padded - n,), yt.dtype)])
        yp = jnp.concatenate([yp, jnp.zeros((padded - n,), yp.dtype)])
    yt2d = yt.reshape(rows, LANE)
    yp2d = yp.reshape(rows, LANE)

    block_rows = min(max_block_rows, ((rows + 7) // 8) * 8)   # multiple of 8
    grid_n = -(-rows // block_rows)
    need_mask = (grid_n * block_rows * LANE) != n

    kernel = functools.partial(_contrastive_loss_kernel, n_valid=n,
                               block_rows=block_rows, need_mask=need_mask)

    scalar_out = jax.ShapeDtypeStruct((1, 1), jnp.float32)
    smem_spec = pl.BlockSpec(memory_space=pltpu.MemorySpace.SMEM)

    s0, s1, s2 = pl.pallas_call(
        kernel,
        out_shape=(scalar_out, scalar_out, scalar_out),
        grid_spec=pltpu.PrefetchScalarGridSpec(
            num_scalar_prefetch=0,
            grid=(grid_n,),
            in_specs=[
                smem_spec,                                           # stats (SMEM)
                pl.BlockSpec((block_rows, LANE), lambda i: (i, 0)),  # y_true tile
                pl.BlockSpec((block_rows, LANE), lambda i: (i, 0)),  # y_pred tile
            ],
            out_specs=[smem_spec, smem_spec, smem_spec],
            scratch_shapes=[pltpu.VMEM((3, 8, LANE), jnp.float32)],
        ),
        compiler_params=pltpu.CompilerParams(
            dimension_semantics=("arbitrary",)),   # reduction axis
    )(stats, yt2d, yp2d)

    inv_n = 1.0 / float(n)
    return (s0[0, 0] * inv_n, s1[0, 0] * inv_n, s2[0, 0] * inv_n)


def _reference(y_true, y_pred, ref):
    yt = jnp.ravel(y_true).astype(jnp.float32)
    yp = jnp.ravel(y_pred).astype(jnp.float32)
    ref = ref.astype(jnp.float32)
    dev = (yp - jnp.mean(ref)) / jnp.std(ref, ddof=1)
    inlier = jnp.abs(dev)
    outlier = jnp.abs(jnp.maximum(CONFIDENCE_MARGIN - dev, 0.0))
    return (jnp.mean((1.0 - yt) * inlier + yt * outlier),
            jnp.mean((1.0 - yt) * inlier),
            jnp.mean(yt * inlier))


if __name__ == "__main__":
    key = jax.random.PRNGKey(0)
    k_ref, k_true, k_pred = jax.random.split(key, 3)

    # Deterministic stand-in for numpy.random.normal(0, 1, 15000)
    ref = jax.random.normal(k_ref, (15000,), dtype=jnp.float32)

    # Small example inputs: y_true are binary labels, y_pred are scores.
    shape = (2, 1000)   # not a multiple of 128 -> exercises the in-kernel mask
    y_true = jax.random.bernoulli(k_true, p=0.3, shape=shape).astype(jnp.float32)
    y_pred = jax.random.normal(k_pred, shape, dtype=jnp.float32) * 2.0 + 0.5

    exp = _reference(y_true, y_pred, ref)

    # Case 1: default (single big tile for this small input).
    out = jax.block_until_ready(contrastive_loss(y_true, y_pred, ref))
    for got, want in zip(out, exp):
        assert jnp.allclose(got, want, rtol=1e-5, atol=1e-5), (got, want)

    # Case 2: tiny block size to exercise the multi-step accumulation path
    # (grid > 1) with a masked partial last tile.
    out2 = jax.block_until_ready(
        contrastive_loss(y_true, y_pred, ref, max_block_rows=8))
    for got, want in zip(out2, exp):
        assert jnp.allclose(got, want, rtol=1e-5, atol=1e-5), (got, want)

    print("KERNEL_OK")
</pallas_src>

<mosaic_0001>
module attributes {stable_mosaic.version = 11 : i64} {
  func.func @_contrastive_loss_kernel(%arg0: i32, %arg1: memref<2xf32, #tpu.memory_space<smem>>, %arg2: memref<16x128xf32, #tpu.memory_space<vmem>>, %arg3: memref<16x128xf32, #tpu.memory_space<vmem>>, %arg4: memref<1x1xf32, #tpu.memory_space<smem>>, %arg5: memref<1x1xf32, #tpu.memory_space<smem>>, %arg6: memref<1x1xf32, #tpu.memory_space<smem>>, %arg7: memref<3x8x128xf32, #tpu.memory_space<vmem>>) attributes {dimension_semantics = [#tpu.dimension_semantics<arbitrary>], iteration_bounds = array<i64: 1>, scalar_prefetch = 0 : i64, scratch_operands = 1 : i64, tpu.core_type = #tpu.core_type<tc>, window_params = [{transform_indices = @transform_0, window_bounds = array<i64: 2>}, {transform_indices = @transform_1, window_bounds = array<i64: 16, 128>}, {transform_indices = @transform_2, window_bounds = array<i64: 16, 128>}, {transform_indices = @transform_3, window_bounds = array<i64: 1, 1>}, {transform_indices = @transform_4, window_bounds = array<i64: 1, 1>}, {transform_indices = @transform_5, window_bounds = array<i64: 1, 1>}]} {
    %c0 = arith.constant 0 : index
    %0 = memref.load %arg1[%c0] : memref<2xf32, #tpu.memory_space<smem>>
    %c1 = arith.constant 1 : index
    %1 = memref.load %arg1[%c1] : memref<2xf32, #tpu.memory_space<smem>>
    %c0_i32 = arith.constant 0 : i32
    %2 = arith.cmpi eq, %arg0, %c0_i32 : i32
    %3 = arith.extui %2 : i1 to i32
    %c0_i32_0 = arith.constant 0 : i32
    %4 = arith.cmpi ne, %3, %c0_i32_0 : i32
    scf.if %4 {
      %cst_29 = arith.constant 0.000000e+00 : f32
      %59 = vector.broadcast %cst_29 : f32 to vector<3x8x128xf32>
      %c0_30 = arith.constant 0 : index
      %c0_31 = arith.constant 0 : index
      %c0_32 = arith.constant 0 : index
      %60 = vector.load %arg7[%c0_30, %c0_31, %c0_32] : memref<3x8x128xf32, #tpu.memory_space<vmem>>, vector<3x8x128xf32>
      tpu.vector_store %arg7[%c0_30, %c0_31, %c0_32], %59 {strides = array<i32>} : memref<3x8x128xf32, #tpu.memory_space<vmem>>, vector<3x8x128xf32>,
    } else {
    }
    %c0_1 = arith.constant 0 : index
    %c0_2 = arith.constant 0 : index
    %5 = vector.load %arg2[%c0_1, %c0_2] : memref<16x128xf32, #tpu.memory_space<vmem>>, vector<16x128xf32>
    %c0_3 = arith.constant 0 : index
    %c0_4 = arith.constant 0 : index
    %6 = vector.load %arg3[%c0_3, %c0_4] : memref<16x128xf32, #tpu.memory_space<vmem>>, vector<16x128xf32>
    %c2048_i32 = arith.constant 2048 : i32
    %7 = arith.muli %arg0, %c2048_i32 : i32
    %8 = tpu.iota {dimensions = array<i32: 0>} : vector<16x128xi32>
    %9 = tpu.iota {dimensions = array<i32: 1>} : vector<16x128xi32>
    %c128_i32 = arith.constant 128 : i32
    %10 = vector.broadcast %c128_i32 : i32 to vector<16x128xi32>
    %11 = arith.muli %8, %10 : vector<16x128xi32>
    %12 = vector.broadcast %7 : i32 to vector<16x128xi32>
    %13 = arith.addi %12, %11 : vector<16x128xi32>
    %14 = arith.addi %13, %9 : vector<16x128xi32>
    %c2000_i32 = arith.constant 2000 : i32
    %15 = vector.broadcast %c2000_i32 : i32 to vector<16x128xi32>
    %16 = arith.cmpi slt, %14, %15 : vector<16x128xi32>
    %cst = arith.constant 0.000000e+00 : f32
    %17 = vector.broadcast %cst : f32 to vector<16x128xf32>
    %18 = arith.select %16, %5, %17 : vector<16x128xi1>, vector<16x128xf32>
    %19 = vector.broadcast %0 : f32 to vector<16x128xf32>
    %20 = arith.select %16, %6, %19 : vector<16x128xi1>, vector<16x128xf32>
    %21 = vector.broadcast %0 : f32 to vector<16x128xf32>
    %22 = arith.subf %20, %21 : vector<16x128xf32>
    %23 = vector.broadcast %1 : f32 to vector<16x128xf32>
    %24 = arith.mulf %22, %23 : vector<16x128xf32>
    %25 = math.absf %24 : vector<16x128xf32>
    %cst_5 = arith.constant 6.000000e+00 : f32
    %26 = vector.broadcast %cst_5 : f32 to vector<16x128xf32>
    %27 = arith.subf %26, %24 : vector<16x128xf32>
    %cst_6 = arith.constant 0.000000e+00 : f32
    %28 = vector.broadcast %cst_6 : f32 to vector<16x128xf32>
    %29 = arith.maximumf %27, %28 : vector<16x128xf32>
    %30 = arith.mulf %18, %25 : vector<16x128xf32>
    %31 = arith.mulf %18, %29 : vector<16x128xf32>
    %c0_7 = arith.constant 0 : index
    %c0_8 = arith.constant 0 : index
    %c0_9 = arith.constant 0 : index
    %32 = vector.load %arg7[%c0_7, %c0_8, %c0_9] : memref<3x8x128xf32, #tpu.memory_space<vmem>>, vector<1x8x128xf32>
    %33 = vector.shape_cast %32 : vector<1x8x128xf32> to vector<8x128xf32>
    %34 = vector.shape_cast %25 : vector<16x128xf32> to vector<2x8x128xf32>
    %cst_10 = arith.constant dense<0.000000e+00> : vector<8x128xf32>
    %35 = vector.multi_reduction <add>, %34, %cst_10 [0] : vector<2x8x128xf32> to vector<8x128xf32>
    %36 = arith.addf %33, %35 : vector<8x128xf32>
    %c0_11 = arith.constant 0 : index
    %c0_12 = arith.constant 0 : index
    %c0_13 = arith.constant 0 : index
    %37 = vector.load %arg7[%c0_11, %c0_12, %c0_13] : memref<3x8x128xf32, #tpu.memory_space<vmem>>, vector<1x8x128xf32>
    %38 = vector.shape_cast %37 : vector<1x8x128xf32> to vector<8x128xf32>
    %39 = vector.shape_cast %36 : vector<8x128xf32> to vector<1x8x128xf32>
    tpu.vector_store %arg7[%c0_11, %c0_12, %c0_13], %39 {strides = array<i32>} : memref<3x8x128xf32, #tpu.memory_space<vmem>>, vector<1x8x128xf32>,
    %c1_14 = arith.constant 1 : index
    %c0_15 = arith.constant 0 : index
    %c0_16 = arith.constant 0 : index
    %40 = vector.load %arg7[%c1_14, %c0_15, %c0_16] : memref<3x8x128xf32, #tpu.memory_space<vmem>>, vector<1x8x128xf32>
    %41 = vector.shape_cast %40 : vector<1x8x128xf32> to vector<8x128xf32>
    %42 = vector.shape_cast %30 : vector<16x128xf32> to vector<2x8x128xf32>
    %cst_17 = arith.constant dense<0.000000e+00> : vector<8x128xf32>
    %43 = vector.multi_reduction <add>, %42, %cst_17 [0] : vector<2x8x128xf32> to vector<8x128xf32>
    %44 = arith.addf %41, %43 : vector<8x128xf32>
    %c1_18 = arith.constant 1 : index
    %c0_19 = arith.constant 0 : index
    %c0_20 = arith.constant 0 : index
    %45 = vector.load %arg7[%c1_18, %c0_19, %c0_20] : memref<3x8x128xf32, #tpu.memory_space<vmem>>, vector<1x8x128xf32>
    %46 = vector.shape_cast %45 : vector<1x8x128xf32> to vector<8x128xf32>
    %47 = vector.shape_cast %44 : vector<8x128xf32> to vector<1x8x128xf32>
    tpu.vector_store %arg7[%c1_18, %c0_19, %c0_20], %47 {strides = array<i32>} : memref<3x8x128xf32, #tpu.memory_space<vmem>>, vector<1x8x128xf32>,
    %c2 = arith.constant 2 : index
    %c0_21 = arith.constant 0 : index
    %c0_22 = arith.constant 0 : index
    %48 = vector.load %arg7[%c2, %c0_21, %c0_22] : memref<3x8x128xf32, #tpu.memory_space<vmem>>, vector<1x8x128xf32>
    %49 = vector.shape_cast %48 : vector<1x8x128xf32> to vector<8x128xf32>
    %50 = vector.shape_cast %31 : vector<16x128xf32> to vector<2x8x128xf32>
    %cst_23 = arith.constant dense<0.000000e+00> : vector<8x128xf32>
    %51 = vector.multi_reduction <add>, %50, %cst_23 [0] : vector<2x8x128xf32> to vector<8x128xf32>
    %52 = arith.addf %49, %51 : vector<8x128xf32>
    %c2_24 = arith.constant 2 : index
    %c0_25 = arith.constant 0 : index
    %c0_26 = arith.constant 0 : index
    %53 = vector.load %arg7[%c2_24, %c0_25, %c0_26] : memref<3x8x128xf32, #tpu.memory_space<vmem>>, vector<1x8x128xf32>
    %54 = vector.shape_cast %53 : vector<1x8x128xf32> to vector<8x128xf32>
    %55 = vector.shape_cast %52 : vector<8x128xf32> to vector<1x8x128xf32>
    tpu.vector_store %arg7[%c2_24, %c0_25, %c0_26], %55 {strides = array<i32>} : memref<3x8x128xf32, #tpu.memory_space<vmem>>, vector<1x8x128xf32>,
    %c0_i32_27 = arith.constant 0 : i32
    %56 = arith.cmpi eq, %arg0, %c0_i32_27 : i32
    %57 = arith.extui %56 : i1 to i32
    %c0_i32_28 = arith.constant 0 : i32
    %58 = arith.cmpi ne, %57, %c0_i32_28 : i32
    scf.if %58 {
      %c0_29 = arith.constant 0 : index
      %c0_30 = arith.constant 0 : index
      %c0_31 = arith.constant 0 : index
      %59 = vector.load %arg7[%c0_29, %c0_30, %c0_31] : memref<3x8x128xf32, #tpu.memory_space<vmem>>, vector<1x8x128xf32>
      %60 = vector.shape_cast %59 : vector<1x8x128xf32> to vector<8x128xf32>
      %61 = vector.shape_cast %60 : vector<8x128xf32> to vector<1x8x128xf32>
      %cst_32 = arith.constant dense<0.000000e+00> : vector<1xf32>
      %62 = vector.multi_reduction <add>, %61, %cst_32 [1, 2] : vector<1x8x128xf32> to vector<1xf32>
      %63 = vector.shape_cast %62 : vector<1xf32> to vector<1x1x1xf32>
      %64 = vector.extract %63[0, 0, 0] : f32 from vector<1x1x1xf32>
      %c1_33 = arith.constant 1 : index
      %c0_34 = arith.constant 0 : index
      %c0_35 = arith.constant 0 : index
      %65 = vector.load %arg7[%c1_33, %c0_34, %c0_35] : memref<3x8x128xf32, #tpu.memory_space<vmem>>, vector<1x8x128xf32>
      %66 = vector.shape_cast %65 : vector<1x8x128xf32> to vector<8x128xf32>
      %67 = vector.shape_cast %66 : vector<8x128xf32> to vector<1x8x128xf32>
      %cst_36 = arith.constant dense<0.000000e+00> : vector<1xf32>
      %68 = vector.multi_reduction <add>, %67, %cst_36 [1, 2] : vector<1x8x128xf32> to vector<1xf32>
      %69 = vector.shape_cast %68 : vector<1xf32> to vector<1x1x1xf32>
      %70 = vector.extract %69[0, 0, 0] : f32 from vector<1x1x1xf32>
      %c2_37 = arith.constant 2 : index
      %c0_38 = arith.constant 0 : index
      %c0_39 = arith.constant 0 : index
      %71 = vector.load %arg7[%c2_37, %c0_38, %c0_39] : memref<3x8x128xf32, #tpu.memory_space<vmem>>, vector<1x8x128xf32>
      %72 = vector.shape_cast %71 : vector<1x8x128xf32> to vector<8x128xf32>
      %73 = vector.shape_cast %72 : vector<8x128xf32> to vector<1x8x128xf32>
      %cst_40 = arith.constant dense<0.000000e+00> : vector<1xf32>
      %74 = vector.multi_reduction <add>, %73, %cst_40 [1, 2] : vector<1x8x128xf32> to vector<1xf32>
      %75 = vector.shape_cast %74 : vector<1xf32> to vector<1x1x1xf32>
      %76 = vector.extract %75[0, 0, 0] : f32 from vector<1x1x1xf32>
      %77 = arith.subf %64, %70 : f32
      %78 = arith.addf %77, %76 : f32
      %c0_41 = arith.constant 0 : index
      %c0_42 = arith.constant 0 : index
      %79 = memref.load %arg4[%c0_41, %c0_42] : memref<1x1xf32, #tpu.memory_space<smem>>
      memref.store %78, %arg4[%c0_41, %c0_42] : memref<1x1xf32, #tpu.memory_space<smem>>
      %c0_43 = arith.constant 0 : index
      %c0_44 = arith.constant 0 : index
      %80 = memref.load %arg5[%c0_43, %c0_44] : memref<1x1xf32, #tpu.memory_space<smem>>
      memref.store %77, %arg5[%c0_43, %c0_44] : memref<1x1xf32, #tpu.memory_space<smem>>
      %c0_45 = arith.constant 0 : index
      %c0_46 = arith.constant 0 : index
      %81 = memref.load %arg6[%c0_45, %c0_46] : memref<1x1xf32, #tpu.memory_space<smem>>
      memref.store %70, %arg6[%c0_45, %c0_46] : memref<1x1xf32, #tpu.memory_space<smem>>
    } else {
    }
    return
  }
  func.func @transform_0(%arg0: i32) -> i32 {
    %c0_i32 = arith.constant 0 : i32
    %c0_i32_0 = arith.constant 0 : i32
    return %c0_i32 : i32
  }
  func.func @transform_1(%arg0: i32) -> (i32, i32) {
    %c0_i32 = arith.constant 0 : i32
    %c0_i32_0 = arith.constant 0 : i32
    return %arg0, %c0_i32 : i32, i32
  }
  func.func @transform_2(%arg0: i32) -> (i32, i32) {
    %c0_i32 = arith.constant 0 : i32
    %c0_i32_0 = arith.constant 0 : i32
    return %arg0, %c0_i32 : i32, i32
  }
  func.func @transform_3(%arg0: i32) -> (i32, i32) {
    %c0_i32 = arith.constant 0 : i32
    %c0_i32_0 = arith.constant 0 : i32
    %c0_i32_1 = arith.constant 0 : i32
    return %c0_i32, %c0_i32_0 : i32, i32
  }
  func.func @transform_4(%arg0: i32) -> (i32, i32) {
    %c0_i32 = arith.constant 0 : i32
    %c0_i32_0 = arith.constant 0 : i32
    %c0_i32_1 = arith.constant 0 : i32
    return %c0_i32, %c0_i32_0 : i32, i32
  }
  func.func @transform_5(%arg0: i32) -> (i32, i32) {
    %c0_i32 = arith.constant 0 : i32
    %c0_i32_0 = arith.constant 0 : i32
    %c0_i32_1 = arith.constant 0 : i32
    return %c0_i32, %c0_i32_0 : i32, i32
  }
}

</mosaic_0001>

<bundles_post_ra>
// kernel: tpu_custom_call.1
= control target key start
LH: loop header
LB: loop body
LE: loop exit
PB: predicated region body
PF: predicated region fallthrough
CT: control target
= control target key end

     0   :  { %11 = vsyncpa [#allocation5], 0  ;;  %s389_s0 = inlined_call_operand.hbm [shape: f32[2], index: 0, kind: input, shape index: {}]   ;;  %s390_s1 = inlined_call_operand.hbm [shape: f32[16,128], index: 1, kind: input, shape index: {}]   ;;  %s391_s2 = inlined_call_operand.hbm [shape: f32[16,128], index: 2, kind: input, shape index: {}]   ;;  %s392_s3 = inlined_call_operand.hbm [shape: f32[1,1], index: 3, kind: output, shape index: {0}]   ;;  %s393_s4 = inlined_call_operand.hbm [shape: f32[1,1], index: 4, kind: output, shape index: {1}]   ;;  %s394_s5 = inlined_call_operand.hbm [shape: f32[1,1], index: 5, kind: output, shape index: {2}]  }
   0x1   :  { %12 = vsyncpa [#allocation4], 0 }
   0x2   :  { %13 = vsyncpa [#allocation9], 0 }
   0x3   :  { %14 = vsyncpa [#allocation6], 0 }
   0x4   :  { %15 = vsyncpa [#allocation12], 0  ;;  %s21_s20 = sshll.u32 %s389_s0, 4  ;;  %s29_s23 = sshll.u32 %s390_s1, 4  ;;  %s22_s20 = int_to_ptr.hbm [resolvable:$true] %s21_s20  ;;  %s30_s23 = int_to_ptr.hbm [resolvable:$true] %s29_s23 }
   0x5   :  { %s333_s24 = smov [#allocation3]   ;;  %s334_s25 = smov [#allocation7]  }
   0x6   :  { %24 = dma.hbm_to_smem %s22_s20, 16, %s333_s24, [#allocation5]  }
   0x7   :  { %s31_s26 = sshll.u32 %s334_s25, 4  ;;  %s335_s27 = smov 128   ;;  %s32_s26 = int_to_ptr.vmem [resolvable:$true] %s31_s26 }
   0x8   :  { %s336_s28 = smov 8   ;;  %s42_s6 = sshll.u32 %s391_s2, 4  ;;  %s43_s6 = int_to_ptr.hbm [resolvable:$true] %s42_s6 }
   0x9   :  { %37 = dma.hbm_to_vmem [thread:$0]  %s30_s23, 256, %s32_s26, [#allocation4], %s335_s27, %s335_s27, %s336_s28  }
   0xa   :  { %s337_s0 = smov [#allocation8]  }
   0xb   :  { %s44_s7 = sshll.u32 %s337_s0, 4  ;;  %s45_s7 = int_to_ptr.vmem [resolvable:$true] %s44_s7 }
   0xc   :  { %50 = dma.hbm_to_vmem [thread:$0]  %s43_s6, 256, %s45_s7, [#allocation9], %s335_s27, %s335_s27, %s336_s28  }
   0xd   :  { %323 = dma.done.wait [#allocation5], 16  }
   0xe   :  { %324 = vsyncadd [#allocation5], 4294967280 }
   0xf   :  { %325 = dma.done.wait [#allocation4], 256  }
  0x10   :  { %326 = vsyncadd [#allocation4], 4294967040 }
  0x11   :  { %327 = dma.done.wait [#allocation9], 256  }
  0x12   :  { %328 = vsyncadd [#allocation9], 4294967040 }
  0x13   :  { %63 = sfence }
  0x14   :  { %s64_s1 = sld [smem:[#allocation3]]  ;;  %v78_v0 = vlaneseq  ;;  %v75_v5 = vld [vmem:[#allocation8] sm:$0xff]  ;;  %v76_v9 = vld [vmem:[#allocation8 + $0x8] sm:$0xff]  ;;  %v73_v17 = vld [vmem:[#allocation7] sm:$0xff]  ;;  %s181_s10 = sshll.u32 %s393_s4, 4  ;;  %s182_s10 = int_to_ptr.hbm [resolvable:$true] %s181_s10 }
  0x15   :  { %s212_s8 = sld [smem:[#allocation3 + $0x1]]  ;;  %v74_v20 = vld [vmem:[#allocation7 + $0x8] sm:$0xff]  ;;  %s172_s14 = sshll.u32 %s392_s3, 4  ;;  %s173_s14 = int_to_ptr.hbm [resolvable:$true] %s172_s14 }
  0x16   :  { %v79_v1 = vshrl.u32 %v78_v0, 7  ;;  %v82_v2 = vand.u32 127, %v78_v0  ;;  %s190_s19 = sshll.u32 %s394_s5, 4  ;;  %s338_s4 = smov [#allocation11]   ;;  %s191_s19 = int_to_ptr.hbm [resolvable:$true] %s190_s19 }
  0x17   :  { %s339_s22 = smov [#allocation10]   ;;  %s340_s23 = smov [#allocation13]  }
  0x18   :  { %v80_v3 = vadd.s32 8, %v79_v1  ;;  %v83_v4 = vmul.u32 128, %v79_v1 }
  0x1a   :  { %v84_v6 = vmul.u32 128, %v80_v3  ;;  %v88_v7 = vadd.s32 %v83_v4, %v82_v2  ;;  %v94_v8 = vstv %s64_s1 }
  0x1b   :  { %v99_v12 = vstv %s212_s8 }
  0x1c   :  { %v89_v10 = vadd.s32 %v84_v6, %v82_v2  ;;  %vm90_vm0 = vcmp.lt.s32.totalorder %v88_v7, 2000 }
  0x1d   :  { %v95_v11 = vsel %vm90_vm0, %v75_v5, %v94_v8  ;;  %v92_v22 = vsel %vm90_vm0, %v73_v17, 0.0 }
  0x1e   :  { %vm91_vm1 = vcmp.lt.s32.totalorder %v89_v10, 2000  ;;  %v97_v13 = vsub.f32 %v95_v11, %v94_v8 }
  0x1f   :  { %v96_v14 = vsel %vm91_vm1, %v76_v9, %v94_v8  ;;  %v93_v26 = vsel %vm91_vm1, %v74_v20, 0.0 }
  0x20   :  { %v98_v15 = vsub.f32 %v96_v14, %v94_v8  ;;  %v100_v16 = vmul.f32 %v99_v12, %v97_v13 }
  0x22   :  { %v101_v18 = vmul.f32 %v99_v12, %v98_v15  ;;  %v102_v19 = vand.u32 2147483647, %v100_v16  ;;  %v104_v21 = vsub.f32 6.0, %v100_v16 }
  0x24   :  { %v103_v23 = vand.u32 2147483647, %v101_v18  ;;  %v105_v24 = vsub.f32 6.0, %v101_v18  ;;  %v106_v25 = vmax.f32 %v104_v21, 0.0  ;;  %v108_v31 = vmul.f32 %v102_v19, %v92_v22 }
  0x26   :  { %v113_v27 = vadd.f32 %v103_v23, %v102_v19  ;;  %v107_v28 = vmax.f32 %v105_v24, 0.0  ;;  %v110_v29 = vmul.f32 %v106_v25, %v92_v22  ;;  %v109_v32 = vmul.f32 %v103_v23, %v93_v26 }
  0x28   :  { %130 = vadd.xlane.f32.xlu0 %v113_v27  ;;  %v111_v30 = vmul.f32 %v107_v28, %v93_v26  ;;  %v118_v34 = vadd.f32 %v109_v32, %v108_v31 }
  0x2a   :  { %v123_v33 = vadd.f32 %v111_v30, %v110_v29 }
  0x2c   :  { %150 = vadd.xlane.f32.xlu1 %v123_v33 }
  0x30   :  { %140 = vadd.xlane.f32.xlu0 %v118_v34 }
  0x9b   :  { %v131_v35 = vpop.xlane.xlu0 %130 }
  0x9c   :  { %v132_v36 = vrot.slane %v131_v35, 4 }
  0x9e   :  { %v133_v37 = vadd.f32 %v132_v36, %v131_v35 }
  0x9f   :  { %v151_v38 = vpop.xlane.xlu1 %150 }
  0xa0   :  { %v134_v39 = vrot.slane %v133_v37, 2  ;;  %v152_v40 = vrot.slane %v151_v38, 4 }
  0xa2   :  { %v153_v41 = vadd.f32 %v152_v40, %v151_v38  ;;  %v135_v42 = vadd.f32 %v134_v39, %v133_v37 }
  0xa3   :  { %v141_v43 = vpop.xlane.xlu0 %140 }
  0xa4   :  { %v154_v44 = vrot.slane %v153_v41, 2  ;;  %v142_v45 = vrot.slane %v141_v43, 4  ;;  %v136_v46 = vrot.slane %v135_v42, 1 }
  0xa6   :  { %v143_v47 = vadd.f32 %v142_v45, %v141_v43  ;;  %v137_v48 = vadd.f32 %v136_v46, %v135_v42  ;;  %v155_v49 = vadd.f32 %v154_v44, %v153_v41 }
  0xa8   :  { %v144_v50 = vrot.slane %v143_v47, 2  ;;  %213 = vpush %v137_v48  ;;  %v156_v52 = vrot.slane %v155_v49, 1 }
  0xaa   :  { %v145_v51 = vadd.f32 %v144_v50, %v143_v47  ;;  %v157_v55 = vadd.f32 %v156_v52, %v155_v49 }
  0xac   :  { %v146_v53 = vrot.slane %v145_v51, 1 }
  0xae   :  { %v147_v54 = vadd.f32 %v146_v53, %v145_v51 }
  0xb0   :  { %215 = vpush %v147_v54 }
  0xb1   :  { %217 = vpush %v157_v55 }
  0xd9   :  { %s214_s11 = spop %213 }
  0xe1   :  { %s216_s15 = spop %215 }
  0xe2   :  { %s159_s16 = ssub.f32 %s214_s11, %s216_s15  ;;  %s218_s20 = spop %217 }
  0xe3   :  { %166 = sst [smem:[#allocation13]] %s216_s15 }
  0xe4   :  { %s160_s21 = sadd.f32 %s218_s20, %s159_s16 }
  0xe5   :  { %164 = sst [smem:[#allocation11]] %s159_s16 }
  0xe6   :  { %162 = sst [smem:[#allocation10]] %s160_s21 }
  0xe7   :  { %184 = dma.smem_to_hbm %s338_s4, 16, %s182_s10, [#allocation12]  }
  0xe8   :  { %175 = dma.smem_to_hbm %s339_s22, 16, %s173_s14, [#allocation6]  }
  0xe9   :  { %193 = dma.smem_to_hbm %s340_s23, 16, %s191_s19, [#allocation12]  }
  0xea   :  { %329 = dma.done.wait [#allocation6], 16  }
  0xeb   :  { %330 = vsyncadd [#allocation6], 4294967280 }
  0xec   :  { %331 = dma.done.wait [#allocation12], 32  }
  0xed   :  { %332 = vsyncadd [#allocation12], 4294967264 }
  0xee   :  { %206 = sfence }
  0xef   :  { %207 = vsyncpa [#allocation4], 1 }
  0xf0   :  { %208 = vsyncpa [#allocation9], 1 }
  0xf1   :  { %209 = vsyncpa [#allocation5], 1 }
  0xf2   :  { %210 = vsyncpa [#allocation6], 1 }
  0xf3   :  { %211 = vsyncpa [#allocation12], 1 }

</bundles_post_ra>
